<compile_context>
chip_gen: v7x
topology: tpu7x:2x2x1
jax: 0.10.0
libtpu: 0.0.40
codegen_flags: <defaults>
</compile_context>

<pallas_src>
import jax
import jax.numpy as jnp
from jax.experimental import pallas as pl
from jax.experimental.pallas import tpu as pltpu


def _round_up(x, m):
    return ((x + m - 1) // m) * m


def _cbpr_kernel(u_ref, cue_ref, items_ref, bias_ref, ctx_ref, w_ref, out_ref):
    # u_ref     : [BT, F]      user embedding (shared by both legs)
    # cue_ref   : [BT, F+1]    context-user embedding with a trailing ones column
    # items_ref : [2, BT, F]   item_i / item_j embeddings
    # bias_ref  : [BT, 2]      item_i / item_j biases
    # ctx_ref   : [2, BT, C]   context_i / context_j features
    # w_ref     : [C, F+1]     [embed_context.W^T | context_bias.W^T]
    # out_ref   : [BT, 2]      (prediction_i, prediction_j)
    u = u_ref[...]
    cue = cue_ref[...]
    w = w_ref[...]

    # One MXU projection per leg: columns 0..F-1 are the projected context,
    # column F is the context bias (folded into the same weight matrix).
    proj_i = jnp.dot(ctx_ref[0], w, preferred_element_type=jnp.float32)  # [BT, F+1]
    proj_j = jnp.dot(ctx_ref[1], w, preferred_element_type=jnp.float32)  # [BT, F+1]

    pred_i = (jnp.sum(u * items_ref[0], axis=-1, keepdims=True)
              + jnp.sum(cue * proj_i, axis=-1, keepdims=True))            # [BT, 1]
    pred_j = (jnp.sum(u * items_ref[1], axis=-1, keepdims=True)
              + jnp.sum(cue * proj_j, axis=-1, keepdims=True))            # [BT, 1]

    out_ref[...] = jnp.concatenate([pred_i, pred_j], axis=-1) + bias_ref[...]


def contextual_bpr_v4(params, user, item_i, item_j, context_i, context_j,
                      *, block_rows=512):
    """Forward pass of ContextualBPRv4. Returns (prediction_i, prediction_j), each [B]."""
    B = user.shape[0]
    F = params["embed_user"].shape[1]
    C = context_i.shape[1]

    # --- batch tiling: BT multiple of 8 sublanes, pad B up to a whole grid ---
    bt = min(block_rows, _round_up(B, 8))
    bt = max(8, (bt // 8) * 8)
    b_pad = _round_up(B, bt)
    num_tiles = b_pad // bt
    pad = b_pad - B

    # --- glue: embedding gathers (data-dependent indexing, stays in XLA) ---
    u_emb = params["embed_user"][user]                       # [B, F]
    cu_emb = params["embed_user_context"][user]              # [B, F]
    ii_emb = params["embed_item"][item_i]                    # [B, F]
    ij_emb = params["embed_item"][item_j]                    # [B, F]
    b_i = params["bias_item"][item_i]                        # [B]
    b_j = params["bias_item"][item_j]                        # [B]

    # coalesced / stacked inputs
    cue = jnp.concatenate([cu_emb, jnp.ones((B, 1), cu_emb.dtype)], axis=1)  # [B, F+1]
    items = jnp.stack([ii_emb, ij_emb], axis=0)              # [2, B, F]
    bias = jnp.stack([b_i, b_j], axis=1)                     # [B, 2]
    ctx = jnp.stack([context_i, context_j], axis=0)          # [2, B, C]
    # fold the context-bias column into the projection weight: [C, F+1]
    w_ext = jnp.concatenate([params["embed_context_w"],
                             params["context_bias_w"]], axis=0).T

    if pad:
        u_emb = jnp.pad(u_emb, ((0, pad), (0, 0)))
        cue = jnp.pad(cue, ((0, pad), (0, 0)))
        items = jnp.pad(items, ((0, 0), (0, pad), (0, 0)))
        bias = jnp.pad(bias, ((0, pad), (0, 0)))
        ctx = jnp.pad(ctx, ((0, 0), (0, pad), (0, 0)))

    out = pl.pallas_call(
        _cbpr_kernel,
        out_shape=jax.ShapeDtypeStruct((b_pad, 2), jnp.float32),
        grid_spec=pltpu.PrefetchScalarGridSpec(
            num_scalar_prefetch=0,
            grid=(num_tiles,),
            in_specs=[
                pl.BlockSpec((bt, F), lambda i: (i, 0)),          # u
                pl.BlockSpec((bt, F + 1), lambda i: (i, 0)),      # cu + ones col
                pl.BlockSpec((2, bt, F), lambda i: (0, i, 0)),    # item_i / item_j
                pl.BlockSpec((bt, 2), lambda i: (i, 0)),          # item biases
                pl.BlockSpec((2, bt, C), lambda i: (0, i, 0)),    # contexts
                pl.BlockSpec((C, F + 1), lambda i: (0, 0)),       # weights, resident
            ],
            out_specs=pl.BlockSpec((bt, 2), lambda i: (i, 0)),
        ),
        compiler_params=pltpu.CompilerParams(
            dimension_semantics=("parallel",),
        ),
    )(u_emb, cue, items, bias, ctx, w_ext)

    return out[:B, 0], out[:B, 1]


def _reference(params, user, item_i, item_j, context_i, context_j):
    u = params["embed_user"][user]
    ii = params["embed_item"][item_i]
    ij = params["embed_item"][item_j]
    b_i = params["bias_item"][item_i]
    b_j = params["bias_item"][item_j]
    pred_i = jnp.sum(u * ii, axis=-1) + b_i
    pred_j = jnp.sum(u * ij, axis=-1) + b_j

    cbias_i = (context_i @ params["context_bias_w"].T)[:, 0]
    cbias_j = (context_j @ params["context_bias_w"].T)[:, 0]
    ci = context_i @ params["embed_context_w"].T
    cj = context_j @ params["embed_context_w"].T
    cu = params["embed_user_context"][user]
    cpred_i = jnp.sum(cu * ci, axis=-1) + cbias_i
    cpred_j = jnp.sum(cu * cj, axis=-1) + cbias_j
    return pred_i + cpred_i, pred_j + cpred_j


if __name__ == "__main__":
    user_num, item_num, factor_num, context_dim = 16, 32, 32, 128

    key = jax.random.PRNGKey(0)
    keys = jax.random.split(key, 10)

    params = {
        # nn.Embedding(user_num, factor_num), init normal std=0.01
        "embed_user": 0.01 * jax.random.normal(keys[0], (user_num, factor_num), jnp.float32),
        # nn.Embedding(item_num, factor_num), init normal std=0.01
        "embed_item": 0.01 * jax.random.normal(keys[1], (item_num, factor_num), jnp.float32),
        # nn.Parameter(torch.zeros(item_num)) — small random values to exercise the path
        "bias_item": 0.1 * jax.random.normal(keys[2], (item_num,), jnp.float32),
        # nn.Linear(context_dim, 1, bias=False): weight [1, context_dim]
        "context_bias_w": 0.05 * jax.random.normal(keys[3], (1, context_dim), jnp.float32),
        # nn.Linear(context_dim, factor_num, bias=False): weight [factor_num, context_dim]
        "embed_context_w": 0.05 * jax.random.normal(keys[4], (factor_num, context_dim), jnp.float32),
        # nn.Embedding(user_num, factor_num) (v4 overrides total_embed_num -> factor_num)
        "embed_user_context": jax.random.normal(keys[5], (user_num, factor_num), jnp.float32),
    }

    # --- check 1: B = 8, single tile ---
    B = 8
    user = jax.random.randint(keys[6], (B,), 0, user_num)
    item_i = jax.random.randint(keys[7], (B,), 0, item_num)
    item_j = jax.random.randint(keys[8], (B,), 0, item_num)
    ctx_key_i, ctx_key_j = jax.random.split(keys[9])
    context_i = jax.random.normal(ctx_key_i, (B, context_dim), jnp.float32)
    context_j = jax.random.normal(ctx_key_j, (B, context_dim), jnp.float32)

    pred_i, pred_j = contextual_bpr_v4(params, user, item_i, item_j, context_i, context_j)
    jax.block_until_ready((pred_i, pred_j))
    ref_i, ref_j = _reference(params, user, item_i, item_j, context_i, context_j)
    assert jnp.allclose(pred_i, ref_i, atol=1e-4, rtol=1e-4), (pred_i, ref_i)
    assert jnp.allclose(pred_j, ref_j, atol=1e-4, rtol=1e-4), (pred_j, ref_j)

    # --- check 2: B = 13 with a tiny tile (exercises multi-tile grid + row padding) ---
    B2 = 13
    k2 = jax.random.split(jax.random.PRNGKey(1), 5)
    user2 = jax.random.randint(k2[0], (B2,), 0, user_num)
    item_i2 = jax.random.randint(k2[1], (B2,), 0, item_num)
    item_j2 = jax.random.randint(k2[2], (B2,), 0, item_num)
    context_i2 = jax.random.normal(k2[3], (B2, context_dim), jnp.float32)
    context_j2 = jax.random.normal(k2[4], (B2, context_dim), jnp.float32)

    pred_i2, pred_j2 = contextual_bpr_v4(params, user2, item_i2, item_j2,
                                         context_i2, context_j2, block_rows=8)
    jax.block_until_ready((pred_i2, pred_j2))
    ref_i2, ref_j2 = _reference(params, user2, item_i2, item_j2, context_i2, context_j2)
    assert jnp.allclose(pred_i2, ref_i2, atol=1e-4, rtol=1e-4), (pred_i2, ref_i2)
    assert jnp.allclose(pred_j2, ref_j2, atol=1e-4, rtol=1e-4), (pred_j2, ref_j2)

    print("KERNEL_OK")
</pallas_src>

<mosaic_0001>
module attributes {stable_mosaic.version = 11 : i64} {
  func.func @_cbpr_kernel(%arg0: i32, %arg1: memref<8x32xf32, #tpu.memory_space<vmem>>, %arg2: memref<8x33xf32, #tpu.memory_space<vmem>>, %arg3: memref<2x8x32xf32, #tpu.memory_space<vmem>>, %arg4: memref<8x2xf32, #tpu.memory_space<vmem>>, %arg5: memref<2x8x128xf32, #tpu.memory_space<vmem>>, %arg6: memref<128x33xf32, #tpu.memory_space<vmem>>, %arg7: memref<8x2xf32, #tpu.memory_space<vmem>>) attributes {dimension_semantics = [#tpu.dimension_semantics<parallel>], iteration_bounds = array<i64: 1>, scalar_prefetch = 0 : i64, scratch_operands = 0 : i64, tpu.core_type = #tpu.core_type<tc>, window_params = [{transform_indices = @transform_0, window_bounds = array<i64: 8, 32>}, {transform_indices = @transform_1, window_bounds = array<i64: 8, 33>}, {transform_indices = @transform_2, window_bounds = array<i64: 2, 8, 32>}, {transform_indices = @transform_3, window_bounds = array<i64: 8, 2>}, {transform_indices = @transform_4, window_bounds = array<i64: 2, 8, 128>}, {pipeline_mode = #tpu.pipeline_mode<synchronous>, transform_indices = @transform_5, window_bounds = array<i64: 128, 33>}, {transform_indices = @transform_6, window_bounds = array<i64: 8, 2>}]} {
    %c0 = arith.constant 0 : index
    %c0_0 = arith.constant 0 : index
    %0 = vector.load %arg1[%c0, %c0_0] : memref<8x32xf32, #tpu.memory_space<vmem>>, vector<8x32xf32>
    %c0_1 = arith.constant 0 : index
    %c0_2 = arith.constant 0 : index
    %1 = vector.load %arg2[%c0_1, %c0_2] : memref<8x33xf32, #tpu.memory_space<vmem>>, vector<8x33xf32>
    %c0_3 = arith.constant 0 : index
    %c0_4 = arith.constant 0 : index
    %2 = vector.load %arg6[%c0_3, %c0_4] : memref<128x33xf32, #tpu.memory_space<vmem>>, vector<128x33xf32>
    %c0_5 = arith.constant 0 : index
    %c0_6 = arith.constant 0 : index
    %c0_7 = arith.constant 0 : index
    %3 = vector.load %arg5[%c0_5, %c0_6, %c0_7] : memref<2x8x128xf32, #tpu.memory_space<vmem>>, vector<1x8x128xf32>
    %4 = vector.shape_cast %3 : vector<1x8x128xf32> to vector<8x128xf32>
    %cst = arith.constant dense<0.000000e+00> : vector<8x33xf32>
    %5 = tpu.matmul %4, %2, %cst {dimension_numbers = #tpu.dot_dimension_numbers<[1], [0], [0], [1], [0, 0, 1, 1], [], []>} : vector<8x128xf32>, vector<128x33xf32>, vector<8x33xf32> -> vector<8x33xf32>
    %c1 = arith.constant 1 : index
    %c0_8 = arith.constant 0 : index
    %c0_9 = arith.constant 0 : index
    %6 = vector.load %arg5[%c1, %c0_8, %c0_9] : memref<2x8x128xf32, #tpu.memory_space<vmem>>, vector<1x8x128xf32>
    %7 = vector.shape_cast %6 : vector<1x8x128xf32> to vector<8x128xf32>
    %cst_10 = arith.constant dense<0.000000e+00> : vector<8x33xf32>
    %8 = tpu.matmul %7, %2, %cst_10 {dimension_numbers = #tpu.dot_dimension_numbers<[1], [0], [0], [1], [0, 0, 1, 1], [], []>} : vector<8x128xf32>, vector<128x33xf32>, vector<8x33xf32> -> vector<8x33xf32>
    %c0_11 = arith.constant 0 : index
    %c0_12 = arith.constant 0 : index
    %c0_13 = arith.constant 0 : index
    %9 = vector.load %arg3[%c0_11, %c0_12, %c0_13] : memref<2x8x32xf32, #tpu.memory_space<vmem>>, vector<1x8x32xf32>
    %10 = vector.shape_cast %9 : vector<1x8x32xf32> to vector<8x32xf32>
    %11 = arith.mulf %0, %10 : vector<8x32xf32>
    %cst_14 = arith.constant dense<0.000000e+00> : vector<8xf32>
    %12 = vector.multi_reduction <add>, %11, %cst_14 [1] : vector<8x32xf32> to vector<8xf32>
    %13 = vector.shape_cast %12 : vector<8xf32> to vector<8x1xf32>
    %14 = arith.mulf %1, %5 : vector<8x33xf32>
    %cst_15 = arith.constant dense<0.000000e+00> : vector<8xf32>
    %15 = vector.multi_reduction <add>, %14, %cst_15 [1] : vector<8x33xf32> to vector<8xf32>
    %16 = vector.shape_cast %15 : vector<8xf32> to vector<8x1xf32>
    %17 = arith.addf %13, %16 : vector<8x1xf32>
    %c1_16 = arith.constant 1 : index
    %c0_17 = arith.constant 0 : index
    %c0_18 = arith.constant 0 : index
    %18 = vector.load %arg3[%c1_16, %c0_17, %c0_18] : memref<2x8x32xf32, #tpu.memory_space<vmem>>, vector<1x8x32xf32>
    %19 = vector.shape_cast %18 : vector<1x8x32xf32> to vector<8x32xf32>
    %20 = arith.mulf %0, %19 : vector<8x32xf32>
    %cst_19 = arith.constant dense<0.000000e+00> : vector<8xf32>
    %21 = vector.multi_reduction <add>, %20, %cst_19 [1] : vector<8x32xf32> to vector<8xf32>
    %22 = vector.shape_cast %21 : vector<8xf32> to vector<8x1xf32>
    %23 = arith.mulf %1, %8 : vector<8x33xf32>
    %cst_20 = arith.constant dense<0.000000e+00> : vector<8xf32>
    %24 = vector.multi_reduction <add>, %23, %cst_20 [1] : vector<8x33xf32> to vector<8xf32>
    %25 = vector.shape_cast %24 : vector<8xf32> to vector<8x1xf32>
    %26 = arith.addf %22, %25 : vector<8x1xf32>
    %27 = tpu.concatenate %17, %26 in 1 : vector<8x1xf32>, vector<8x1xf32> -> vector<8x2xf32>
    %c0_21 = arith.constant 0 : index
    %c0_22 = arith.constant 0 : index
    %28 = vector.load %arg4[%c0_21, %c0_22] : memref<8x2xf32, #tpu.memory_space<vmem>>, vector<8x2xf32>
    %29 = arith.addf %27, %28 : vector<8x2xf32>
    %c0_23 = arith.constant 0 : index
    %c0_24 = arith.constant 0 : index
    %30 = vector.load %arg7[%c0_23, %c0_24] : memref<8x2xf32, #tpu.memory_space<vmem>>, vector<8x2xf32>
    tpu.vector_store %arg7[%c0_23, %c0_24], %29 {strides = array<i32>} : memref<8x2xf32, #tpu.memory_space<vmem>>, vector<8x2xf32>,
    return
  }
  func.func @transform_0(%arg0: i32) -> (i32, i32) {
    %c0_i32 = arith.constant 0 : i32
    %c0_i32_0 = arith.constant 0 : i32
    return %arg0, %c0_i32 : i32, i32
  }
  func.func @transform_1(%arg0: i32) -> (i32, i32) {
    %c0_i32 = arith.constant 0 : i32
    %c0_i32_0 = arith.constant 0 : i32
    return %arg0, %c0_i32 : i32, i32
  }
  func.func @transform_2(%arg0: i32) -> (i32, i32, i32) {
    %c0_i32 = arith.constant 0 : i32
    %c0_i32_0 = arith.constant 0 : i32
    %c0_i32_1 = arith.constant 0 : i32
    return %c0_i32, %arg0, %c0_i32_0 : i32, i32, i32
  }
  func.func @transform_3(%arg0: i32) -> (i32, i32) {
    %c0_i32 = arith.constant 0 : i32
    %c0_i32_0 = arith.constant 0 : i32
    return %arg0, %c0_i32 : i32, i32
  }
  func.func @transform_4(%arg0: i32) -> (i32, i32, i32) {
    %c0_i32 = arith.constant 0 : i32
    %c0_i32_0 = arith.constant 0 : i32
    %c0_i32_1 = arith.constant 0 : i32
    return %c0_i32, %arg0, %c0_i32_0 : i32, i32, i32
  }
  func.func @transform_5(%arg0: i32) -> (i32, i32) {
    %c0_i32 = arith.constant 0 : i32
    %c0_i32_0 = arith.constant 0 : i32
    %c0_i32_1 = arith.constant 0 : i32
    return %c0_i32, %c0_i32_0 : i32, i32
  }
  func.func @transform_6(%arg0: i32) -> (i32, i32) {
    %c0_i32 = arith.constant 0 : i32
    %c0_i32_0 = arith.constant 0 : i32
    return %arg0, %c0_i32 : i32, i32
  }
}

</mosaic_0001>

<bundles_post_ra>
// kernel: tpu_custom_call.1
= control target key start
LH: loop header
LB: loop body
LE: loop exit
PB: predicated region body
PF: predicated region fallthrough
CT: control target
= control target key end

     0   :  { %v374_v0 = vmov 0.0|0.0   ;;  %vm375_vm0 = vmmov 0   ;;  %v376_v6 = vmov 0.0   ;;  %vm186_vm1 = vcmask 261120   ;;  %s484_s5 = inlined_call_operand.vmem [shape: f32[128,33], index: 5, kind: input, shape index: {}]   ;;  %s485_s4 = inlined_call_operand.vmem [shape: f32[2,8,128], index: 4, kind: input, shape index: {}]   ;;  %s486_s0 = inlined_call_operand.vmem [shape: f32[8,32], index: 0, kind: input, shape index: {}]   ;;  %s487_s2 = inlined_call_operand.vmem [shape: f32[2,8,32], index: 2, kind: input, shape index: {}]   ;;  %s488_s1 = inlined_call_operand.vmem [shape: f32[8,33], index: 1, kind: input, shape index: {}]   ;;  %s489_s3 = inlined_call_operand.vmem [shape: f32[8,2], index: 3, kind: input, shape index: {}]   ;;  %s490_s6 = inlined_call_operand.vmem [shape: f32[8,2], index: 6, kind: output, shape index: {}]  }
   0x1   :  { %323 = vmatprep.subr.bf16.mxu0 %v374_v0  ;;  %347 = vmatprep.subr.bf16.mxu1 %v374_v0  ;;  %v25_v1 = vld [vmem:[%s484_s5] sm:$0xff]  ;;  %v26_v2 = vld [vmem:[%s484_s5 + $0x8] sm:$0xff]  ;;  %v27_v3 = vld [vmem:[%s484_s5 + $0x10] sm:$0xff]  ;;  %vm191_vm2 = vcmask 269312   ;;  %vm207_vm3 = vcmask 7168   ;;  %vm211_vm4 = vcmask 15360  }
   0x2   :  { %v324_v4 = vpack.c.bf16 %v26_v2, %v25_v1  ;;  %v28_v5 = vld [vmem:[%s484_s5 + $0x18] sm:$0xff]  ;;  %285 = vmatprep.mubr.msk.f32.mxu0 %vm375_vm0, %v376_v6  ;;  %320 = vmatprep.mubr.msk.f32.mxu1 %vm375_vm0, %v376_v6  ;;  %v29_v8 = vld [vmem:[%s484_s5 + $0x20] sm:$0xff]  ;;  %v30_v9 = vld [vmem:[%s484_s5 + $0x28] sm:$0xff] }
   0x3   :  { %v327_v7 = vpack.c.bf16 %v28_v5, %v27_v3  ;;  %v330_v10 = vpack.c.bf16 %v30_v9, %v29_v8  ;;  %v31_v11 = vld [vmem:[%s484_s5 + $0x30] sm:$0xff]  ;;  %v32_v12 = vld [vmem:[%s484_s5 + $0x38] sm:$0xff]  ;;  %v33_v14 = vld [vmem:[%s484_s5 + $0x40] sm:$0xff] }
   0x4   :  { %325 = vmatpush3.bf16.msra.mxu0 %v324_v4  ;;  %349 = vmatpush3.bf16.msra.mxu1 %v324_v4  ;;  %v333_v13 = vpack.c.bf16 %v32_v12, %v31_v11  ;;  %v34_v15 = vld [vmem:[%s484_s5 + $0x48] sm:$0xff]  ;;  %v35_v17 = vld [vmem:[%s484_s5 + $0x50] sm:$0xff]  ;;  %v36_v18 = vld [vmem:[%s484_s5 + $0x58] sm:$0xff] }
   0x5   :  { %326 = vmatprep.subr.bf16.mxu0 %v374_v0  ;;  %350 = vmatprep.subr.bf16.mxu1 %v374_v0  ;;  %v336_v16 = vpack.c.bf16 %v34_v15, %v33_v14  ;;  %v339_v19 = vpack.c.bf16 %v36_v18, %v35_v17  ;;  %v37_v20 = vld [vmem:[%s484_s5 + $0x60] sm:$0xff]  ;;  %v38_v21 = vld [vmem:[%s484_s5 + $0x68] sm:$0xff]  ;;  %v39_v23 = vld [vmem:[%s484_s5 + $0x70] sm:$0xff] }
   0x6   :  { %v342_v22 = vpack.c.bf16 %v38_v21, %v37_v20  ;;  %v40_v24 = vld [vmem:[%s484_s5 + $0x78] sm:$0xff]  ;;  %v41_v26 = vld [vmem:[%s485_s4] sm:$0xff]  ;;  %v217_v27 = vld [vmem:[%s485_s4 + $0x8] sm:$0xff] }
   0x7   :  { %v345_v25 = vpack.c.bf16 %v40_v24, %v39_v23  ;;  %v23_v28 = vld [vmem:[%s486_s0] sm:$0xff]  ;;  %v218_v29 = vld [vmem:[%s487_s2 + $0x8] sm:$0xff] }
   0x8   :  { %328 = vmatpush3.bf16.msra.mxu0 %v327_v7  ;;  %352 = vmatpush3.bf16.msra.mxu1 %v327_v7  ;;  %v184_v30 = vld [vmem:[%s487_s2] sm:$0xff]  ;;  %v198_v31 = vmul.f32 %v218_v29, %v23_v28 }
   0x9   :  { %329 = vmatprep.subr.bf16.mxu0 %v374_v0  ;;  %353 = vmatprep.subr.bf16.mxu1 %v374_v0  ;;  %v185_v32 = vmul.f32 %v184_v30, %v23_v28  ;;  %v24_v35 = vld [vmem:[%s488_s1] sm:$0xff] }
   0xa   :  { %v199_v33 = vsel %vm186_vm1, %v198_v31, 0.0  ;;  %v209_v49 = vld [vmem:[%s489_s3] sm:$0xff] }
   0xb   :  { %v187_v34 = vsel %vm186_vm1, %v185_v32, 0.0  ;;  %200 = vadd.xlane.f32.xlu1 %v199_v33 }
   0xc   :  { %331 = vmatpush3.bf16.msra.mxu0 %v330_v10  ;;  %355 = vmatpush3.bf16.msra.mxu1 %v330_v10 }
   0xd   :  { %332 = vmatprep.subr.bf16.mxu0 %v374_v0  ;;  %356 = vmatprep.subr.bf16.mxu1 %v374_v0 }
   0xe   :  { %188 = vadd.xlane.f32.xlu0 %v187_v34 }
  0x10   :  { %334 = vmatpush3.bf16.msra.mxu0 %v333_v13  ;;  %358 = vmatpush3.bf16.msra.mxu1 %v333_v13 }
  0x11   :  { %335 = vmatprep.subr.bf16.mxu0 %v374_v0  ;;  %359 = vmatprep.subr.bf16.mxu1 %v374_v0 }
  0x14   :  { %337 = vmatpush3.bf16.msra.mxu0 %v336_v16  ;;  %361 = vmatpush3.bf16.msra.mxu1 %v336_v16 }
  0x15   :  { %338 = vmatprep.subr.bf16.mxu0 %v374_v0  ;;  %362 = vmatprep.subr.bf16.mxu1 %v374_v0 }
  0x18   :  { %340 = vmatpush3.bf16.msra.mxu0 %v339_v19  ;;  %364 = vmatpush3.bf16.msra.mxu1 %v339_v19 }
  0x19   :  { %341 = vmatprep.subr.bf16.mxu0 %v374_v0  ;;  %365 = vmatprep.subr.bf16.mxu1 %v374_v0 }
  0x1c   :  { %343 = vmatpush3.bf16.msra.mxu0 %v342_v22  ;;  %367 = vmatpush3.bf16.msra.mxu1 %v342_v22 }
  0x1d   :  { %344 = vmatprep.subr.bf16.mxu0 %v374_v0  ;;  %368 = vmatprep.subr.bf16.mxu1 %v374_v0 }
  0x20   :  { %346 = vmatpush3.bf16.msra.mxu0 %v345_v25  ;;  %370 = vmatpush3.bf16.msra.mxu1 %v345_v25 }
  0x23   :  { %286 = vmatmul.mubr.f32.vlgmr.msra.gmra.mrb[0].mxu0 %v41_v26  ;;  %321 = vmatmul.mubr.f32.vlgmr.msra.gmra.mrb[0].mxu1 %v217_v27 }
  0x98   :  { %v201_v44 = vpop.xlane.xlu1 %200 }
  0x9b   :  { %v189_v45 = vpop.xlane.xlu0 %188 }
  0xf6   :  { %v108_v36 = vpop.f32.mrb[0].mxu0  ;;  %v180_v37 = vpop.f32.mrb[0].mxu1 }
  0xf7   :  { %v190_v38 = vmul.f32 %v108_v36, %v24_v35  ;;  %v202_v39 = vmul.f32 %v180_v37, %v24_v35  ;;  %v287_v40 = vpop.f32.mrb[1].mxu0  ;;  %v322_v41 = vpop.f32.mrb[1].mxu1 }
  0xf9   :  { %v203_v42 = vsel %vm191_vm2, %v202_v39, 0.0  ;;  %v192_v43 = vsel %vm191_vm2, %v190_v38, 0.0 }
  0xfa   :  { %204 = vadd.xlane.f32.xlu1 %v203_v42  ;;  %193 = vadd.xlane.f32.xlu0 %v192_v43 }
 0x187   :  { %v205_v46 = vpop.xlane.xlu1 %204  ;;  %v194_v47 = vpop.xlane.xlu0 %193 }
 0x188   :  { %v206_v48 = vadd.f32 %v205_v46, %v201_v44  ;;  %v195_v50 = vadd.f32 %v194_v47, %v189_v45 }
 0x18a   :  { %v208_v51 = vsel %vm207_vm3, %v195_v50, %v206_v48 }
 0x18b   :  { %v210_v52 = vadd.f32 %v209_v49, %v208_v51 }
 0x18d   :  { %212 = vst.msk [vmem:[%s490_s6] sm:$0xff] %vm211_vm4, %v210_v52 }

</bundles_post_ra>
